<compile_context>
chip_gen: v5e
topology: v5e:2x2
jax: 0.10.0
libtpu: 0.0.40
codegen_flags: <defaults>
</compile_context>

<pallas_src>
import jax
import jax.numpy as jnp
from jax import lax
from jax.experimental import pallas as pl
from jax.experimental.pallas import tpu as pltpu


def _softplus(x):
    # matches torch.nn.functional.softplus(beta=1, threshold=20)
    return jnp.where(x > 20.0, x, jnp.log1p(jnp.exp(jnp.minimum(x, 20.0))))


def gru_encoder_kernel(x_ref, wih_ref, whh_ref, bias_ref, wheads_ref, bheads_ref,
                       out_ref, gx_ref):
    """GRU recurrence + fused mean/std heads, fully resident in VMEM/vregs.

    x_ref:      (Bp*T, D)  batch-major inputs (row = b*T + t; free reshape of (Bp,T,D))
    wih_ref:    (D, 3H)    input->gate weights, gate order [r | z | n]
    whh_ref:    (H, 3H)    hidden->gate weights, gate order [r | z | n]
    bias_ref:   (2, 3H)    row 0: [b_ir+b_hr | b_iz+b_hz | b_in]   (input-path bias)
                           row 1: [   0      |     0     | b_hn]   (hidden-path bias)
    wheads_ref: (H, 2Z)    [w_mean^T | w_std^T]
    bheads_ref: (1, 2Z)    [b_mean   | b_std  ]
    out_ref:    (Bp, 2Z)   [mean | softplus(std_pre)]
    gx_ref:     (Bp*T, 3H) VMEM scratch: precomputed input-path gate activations
    """
    Bp = out_ref.shape[0]
    TB = x_ref.shape[0]
    T = TB // Bp
    H = whh_ref.shape[0]
    H2 = 2 * H
    Z = out_ref.shape[1] // 2

    # ---- hoisted input path: ONE fused (T*B, D) x (D, 3H) MXU call, biases folded ----
    gx_ref[...] = (
        jnp.dot(x_ref[...], wih_ref[...], preferred_element_type=jnp.float32)
        + bias_ref[0:1, :]
    )

    # hoisted weight load / bias broadcast (not re-issued per step)
    whh = whh_ref[...]
    bias_h = jnp.broadcast_to(bias_ref[1:2, :], (Bp, 3 * H))   # [0 | 0 | b_hn]

    # ---- recurrence: h carried in vregs; per-step gx rows loaded from scratch ----
    # TODO(synk): for large T, switch to lax.fori_loop(..., unroll=2..4) to bound
    # bundle count / compile time; T is small and static here so full unroll is fine.
    h = jnp.zeros((Bp, H), jnp.float32)
    for t in range(T):
        # rows {b*T + t : b in [0, Bp)}: sublane-strided read, static start & stride
        gx_t = gx_ref[pl.ds(t, Bp, stride=T), :]                      # (Bp, 3H)
        gh = jnp.dot(h, whh, preferred_element_type=jnp.float32) + bias_h
        rz = jax.nn.sigmoid(gx_t[:, :H2] + gh[:, :H2])
        r = rz[:, :H]
        z = rz[:, H:]
        n = jnp.tanh(gx_t[:, H2:] + r * gh[:, H2:])
        h = n + z * (h - n)          # == (1 - z) * n + z * h

    # ---- fused output heads: one MXU call, one lane-denser store ----
    heads = jnp.dot(h, wheads_ref[...],
                    preferred_element_type=jnp.float32) + bheads_ref[...]
    lane = lax.broadcasted_iota(jnp.int32, heads.shape, 1)
    out_ref[...] = jnp.where(lane < Z, heads, _softplus(heads))


def _round_up(n, m):
    return ((n + m - 1) // m) * m


def _tile_words(r, c):
    # f32 word count for an (r, c) array padded to (8, 128) VMEM tiles
    return _round_up(max(r, 1), 8) * _round_up(max(c, 1), 128)


@jax.jit
def gru_encoder_forward(x_btd, params):
    """x_btd: (B, T, D) float32 (batch_first=True). Returns (mean, std), each (B, Z).

    params use PyTorch nn.GRU / nn.Linear layouts (gate order r, z, n):
      w_ih (3H, D), w_hh (3H, H), b_ih (3H,), b_hh (3H,),
      w_mean / w_std (Z, H), b_mean / b_std (Z,)
    """
    B, T, D = x_btd.shape
    H = params["w_hh"].shape[1]
    Z = params["w_mean"].shape[0]

    # Pad batch to a sublane multiple (8); padded rows are computed then discarded.
    Bp = max(8, _round_up(B, 8))
    x_pad = x_btd if Bp == B else jnp.pad(x_btd, ((0, Bp - B), (0, 0), (0, 0)))
    # Batch-major flatten is a free reshape: no HBM transpose on the latency path.
    x_flat = x_pad.reshape(Bp * T, D)

    # Concatenated-gate weights/biases (gate column blocks stay [r | z | n]).
    w_ih, w_hh = params["w_ih"], params["w_hh"]
    b_ih, b_hh = params["b_ih"], params["b_hh"]
    wih_cat = w_ih.T                                   # (D, 3H)
    whh_cat = w_hh.T                                   # (H, 3H)
    bias_x = jnp.concatenate([b_ih[:2 * H] + b_hh[:2 * H], b_ih[2 * H:]])     # (3H,)
    bias_h = jnp.concatenate([jnp.zeros((2 * H,), b_hh.dtype), b_hh[2 * H:]])  # (3H,)
    bias = jnp.stack([bias_x, bias_h])                 # (2, 3H)
    w_heads = jnp.concatenate([params["w_mean"].T, params["w_std"].T], axis=1)  # (H, 2Z)
    b_heads = jnp.concatenate([params["b_mean"], params["b_std"]]).reshape(1, 2 * Z)

    # Explicit VMEM budget (all-resident, single invocation, no pipelining buffers).
    vmem_words = (
        _tile_words(Bp * T, D) + _tile_words(Bp * T, 3 * H)       # x, gx scratch
        + _tile_words(D, 3 * H) + _tile_words(H, 3 * H)           # W_ih, W_hh
        + _tile_words(2, 3 * H) + _tile_words(H, 2 * Z)           # bias, W_heads
        + _tile_words(1, 2 * Z) + _tile_words(Bp, 2 * Z)          # b_heads, out
    )
    vmem_limit = int(min(64 * 1024 * 1024, max(8 * 1024 * 1024, 4 * 4 * vmem_words)))

    vmem = pl.BlockSpec(memory_space=pltpu.MemorySpace.VMEM)
    out = pl.pallas_call(
        gru_encoder_kernel,
        out_shape=jax.ShapeDtypeStruct((Bp, 2 * Z), jnp.float32),
        in_specs=[vmem] * 6,
        out_specs=vmem,
        scratch_shapes=[pltpu.VMEM((Bp * T, 3 * H), jnp.float32)],
        compiler_params=pltpu.CompilerParams(vmem_limit_bytes=vmem_limit),
    )(x_flat, wih_cat, whh_cat, bias, w_heads, b_heads)

    mean = out[:B, :Z]
    std = out[:B, Z:]
    return mean, std


def init_params(key, input_size, hidden_size, z_size):
    """Deterministic synthetic parameters in PyTorch layout, uniform(-1/sqrt(H), 1/sqrt(H))."""
    ks = jax.random.split(key, 8)
    bound = 1.0 / jnp.sqrt(jnp.float32(hidden_size))

    def u(k, shape):
        return jax.random.uniform(k, shape, jnp.float32, -bound, bound)

    return {
        "w_ih": u(ks[0], (3 * hidden_size, input_size)),
        "w_hh": u(ks[1], (3 * hidden_size, hidden_size)),
        "b_ih": u(ks[2], (3 * hidden_size,)),
        "b_hh": u(ks[3], (3 * hidden_size,)),
        "w_mean": u(ks[4], (z_size, hidden_size)),
        "b_mean": u(ks[5], (z_size,)),
        "w_std": u(ks[6], (z_size, hidden_size)),
        "b_std": u(ks[7], (z_size,)),
    }


def reference_forward(x_btd, params):
    """Pure-JAX reference of nn.GRU (1 layer) + mean/softplus(std) heads."""
    B, T, D = x_btd.shape
    H = params["w_hh"].shape[1]
    w_ih = params["w_ih"].T     # (D, 3H)
    w_hh = params["w_hh"].T     # (H, 3H)
    b_ih = params["b_ih"]
    b_hh = params["b_hh"]
    h = jnp.zeros((B, H), jnp.float32)
    for t in range(T):
        gx = x_btd[:, t, :] @ w_ih + b_ih
        gh = h @ w_hh + b_hh
        r = jax.nn.sigmoid(gx[:, :H] + gh[:, :H])
        z = jax.nn.sigmoid(gx[:, H:2 * H] + gh[:, H:2 * H])
        n = jnp.tanh(gx[:, 2 * H:] + r * gh[:, 2 * H:])
        h = (1.0 - z) * n + z * h
    mean = h @ params["w_mean"].T + params["b_mean"]
    std = _softplus(h @ params["w_std"].T + params["b_std"])
    return mean, std


if __name__ == "__main__":
    # Small shapes consistent with the module's forward (type='static', rim=False):
    B, T = 4, 8
    input_size, hidden_size, z_size = 32, 32, 32

    key = jax.random.PRNGKey(0)
    k_x, k_p = jax.random.split(key)
    x = jax.random.normal(k_x, (B, T, input_size), jnp.float32)
    params = init_params(k_p, input_size, hidden_size, z_size)

    mean, std = gru_encoder_forward(x, params)
    jax.block_until_ready((mean, std))

    mean_ref, std_ref = reference_forward(x, params)
    assert mean.shape == (B, z_size) and std.shape == (B, z_size)
    assert jnp.allclose(mean, mean_ref, atol=1e-4, rtol=1e-4)
    assert jnp.allclose(std, std_ref, atol=1e-4, rtol=1e-4)
    assert bool(jnp.all(std > 0.0))

    print("KERNEL_OK")
</pallas_src>

<mosaic_0001>
module attributes {stable_mosaic.version = 11 : i64} {
  func.func @gru_encoder_kernel(%arg0: memref<64x32xf32, #tpu.memory_space<vmem>>, %arg1: memref<32x96xf32, #tpu.memory_space<vmem>>, %arg2: memref<32x96xf32, #tpu.memory_space<vmem>>, %arg3: memref<2x96xf32, #tpu.memory_space<vmem>>, %arg4: memref<32x64xf32, #tpu.memory_space<vmem>>, %arg5: memref<1x64xf32, #tpu.memory_space<vmem>>, %arg6: memref<8x64xf32, #tpu.memory_space<vmem>>, %arg7: memref<64x96xf32, #tpu.memory_space<vmem>>) attributes {dimension_semantics = [], scalar_prefetch = 0 : i64, scratch_operands = 1 : i64, tpu.core_type = #tpu.core_type<tc>} {
    %c0 = arith.constant 0 : index
    %c0_0 = arith.constant 0 : index
    %0 = vector.load %arg0[%c0, %c0_0] : memref<64x32xf32, #tpu.memory_space<vmem>>, vector<64x32xf32>
    %c0_1 = arith.constant 0 : index
    %c0_2 = arith.constant 0 : index
    %1 = vector.load %arg1[%c0_1, %c0_2] : memref<32x96xf32, #tpu.memory_space<vmem>>, vector<32x96xf32>
    %cst = arith.constant dense<0.000000e+00> : vector<64x96xf32>
    %2 = tpu.matmul %0, %1, %cst {dimension_numbers = #tpu.dot_dimension_numbers<[1], [0], [0], [1], [0, 0, 1, 1], [], []>} : vector<64x32xf32>, vector<32x96xf32>, vector<64x96xf32> -> vector<64x96xf32>
    %c0_3 = arith.constant 0 : index
    %c0_4 = arith.constant 0 : index
    %3 = vector.load %arg3[%c0_3, %c0_4] : memref<2x96xf32, #tpu.memory_space<vmem>>, vector<1x96xf32>
    %4 = vector.broadcast %3 : vector<1x96xf32> to vector<64x96xf32>
    %5 = arith.addf %2, %4 : vector<64x96xf32>
    %c0_5 = arith.constant 0 : index
    %c0_6 = arith.constant 0 : index
    %6 = vector.load %arg7[%c0_5, %c0_6] : memref<64x96xf32, #tpu.memory_space<vmem>>, vector<64x96xf32>
    tpu.vector_store %arg7[%c0_5, %c0_6], %5 {strides = array<i32>} : memref<64x96xf32, #tpu.memory_space<vmem>>, vector<64x96xf32>,
    %c0_7 = arith.constant 0 : index
    %c0_8 = arith.constant 0 : index
    %7 = vector.load %arg2[%c0_7, %c0_8] : memref<32x96xf32, #tpu.memory_space<vmem>>, vector<32x96xf32>
    %c1 = arith.constant 1 : index
    %c0_9 = arith.constant 0 : index
    %8 = vector.load %arg3[%c1, %c0_9] : memref<2x96xf32, #tpu.memory_space<vmem>>, vector<1x96xf32>
    %9 = vector.shape_cast %8 : vector<1x96xf32> to vector<1x96xf32>
    %10 = vector.broadcast %9 : vector<1x96xf32> to vector<8x96xf32>
    %cst_10 = arith.constant 0.000000e+00 : f32
    %11 = vector.broadcast %cst_10 : f32 to vector<8x32xf32>
    %c0_11 = arith.constant 0 : index
    %c0_12 = arith.constant 0 : index
    %12 = tpu.strided_load %arg7[%c0_11, %c0_12] {strides = array<i32: 8, 1>} : memref<64x96xf32, #tpu.memory_space<vmem>>, vector<8x96xf32>
    %cst_13 = arith.constant dense<0.000000e+00> : vector<8x96xf32>
    %13 = tpu.matmul %11, %7, %cst_13 {dimension_numbers = #tpu.dot_dimension_numbers<[1], [0], [0], [1], [0, 0, 1, 1], [], []>} : vector<8x32xf32>, vector<32x96xf32>, vector<8x96xf32> -> vector<8x96xf32>
    %14 = arith.addf %13, %10 : vector<8x96xf32>
    %15 = vector.extract_strided_slice %12 {offsets = [0, 0], sizes = [8, 64], strides = [1, 1]} : vector<8x96xf32> to vector<8x64xf32>
    %16 = vector.extract_strided_slice %14 {offsets = [0, 0], sizes = [8, 64], strides = [1, 1]} : vector<8x96xf32> to vector<8x64xf32>
    %17 = arith.addf %15, %16 : vector<8x64xf32>
    %18 = arith.negf %17 : vector<8x64xf32>
    %19 = math.exp %18 : vector<8x64xf32>
    %cst_14 = arith.constant 1.000000e+00 : f32
    %20 = vector.broadcast %cst_14 : f32 to vector<8x64xf32>
    %21 = arith.addf %20, %19 : vector<8x64xf32>
    %22 = arith.divf %20, %21 : vector<8x64xf32>
    %23 = vector.extract_strided_slice %22 {offsets = [0, 0], sizes = [8, 32], strides = [1, 1]} : vector<8x64xf32> to vector<8x32xf32>
    %24 = vector.extract_strided_slice %22 {offsets = [0, 32], sizes = [8, 32], strides = [1, 1]} : vector<8x64xf32> to vector<8x32xf32>
    %25 = vector.extract_strided_slice %12 {offsets = [0, 64], sizes = [8, 32], strides = [1, 1]} : vector<8x96xf32> to vector<8x32xf32>
    %26 = vector.extract_strided_slice %14 {offsets = [0, 64], sizes = [8, 32], strides = [1, 1]} : vector<8x96xf32> to vector<8x32xf32>
    %27 = arith.mulf %23, %26 : vector<8x32xf32>
    %28 = arith.addf %25, %27 : vector<8x32xf32>
    %29 = math.tanh %28 : vector<8x32xf32>
    %30 = arith.subf %11, %29 : vector<8x32xf32>
    %31 = arith.mulf %24, %30 : vector<8x32xf32>
    %32 = arith.addf %29, %31 : vector<8x32xf32>
    %c1_15 = arith.constant 1 : index
    %c0_16 = arith.constant 0 : index
    %33 = tpu.strided_load %arg7[%c1_15, %c0_16] {strides = array<i32: 8, 1>} : memref<64x96xf32, #tpu.memory_space<vmem>>, vector<8x96xf32>
    %cst_17 = arith.constant dense<0.000000e+00> : vector<8x96xf32>
    %34 = tpu.matmul %32, %7, %cst_17 {dimension_numbers = #tpu.dot_dimension_numbers<[1], [0], [0], [1], [0, 0, 1, 1], [], []>} : vector<8x32xf32>, vector<32x96xf32>, vector<8x96xf32> -> vector<8x96xf32>
    %35 = arith.addf %34, %10 : vector<8x96xf32>
    %36 = vector.extract_strided_slice %33 {offsets = [0, 0], sizes = [8, 64], strides = [1, 1]} : vector<8x96xf32> to vector<8x64xf32>
    %37 = vector.extract_strided_slice %35 {offsets = [0, 0], sizes = [8, 64], strides = [1, 1]} : vector<8x96xf32> to vector<8x64xf32>
    %38 = arith.addf %36, %37 : vector<8x64xf32>
    %39 = arith.negf %38 : vector<8x64xf32>
    %40 = math.exp %39 : vector<8x64xf32>
    %cst_18 = arith.constant 1.000000e+00 : f32
    %41 = vector.broadcast %cst_18 : f32 to vector<8x64xf32>
    %42 = arith.addf %41, %40 : vector<8x64xf32>
    %43 = arith.divf %41, %42 : vector<8x64xf32>
    %44 = vector.extract_strided_slice %43 {offsets = [0, 0], sizes = [8, 32], strides = [1, 1]} : vector<8x64xf32> to vector<8x32xf32>
    %45 = vector.extract_strided_slice %43 {offsets = [0, 32], sizes = [8, 32], strides = [1, 1]} : vector<8x64xf32> to vector<8x32xf32>
    %46 = vector.extract_strided_slice %33 {offsets = [0, 64], sizes = [8, 32], strides = [1, 1]} : vector<8x96xf32> to vector<8x32xf32>
    %47 = vector.extract_strided_slice %35 {offsets = [0, 64], sizes = [8, 32], strides = [1, 1]} : vector<8x96xf32> to vector<8x32xf32>
    %48 = arith.mulf %44, %47 : vector<8x32xf32>
    %49 = arith.addf %46, %48 : vector<8x32xf32>
    %50 = math.tanh %49 : vector<8x32xf32>
    %51 = arith.subf %32, %50 : vector<8x32xf32>
    %52 = arith.mulf %45, %51 : vector<8x32xf32>
    %53 = arith.addf %50, %52 : vector<8x32xf32>
    %c2 = arith.constant 2 : index
    %c0_19 = arith.constant 0 : index
    %54 = tpu.strided_load %arg7[%c2, %c0_19] {strides = array<i32: 8, 1>} : memref<64x96xf32, #tpu.memory_space<vmem>>, vector<8x96xf32>
    %cst_20 = arith.constant dense<0.000000e+00> : vector<8x96xf32>
    %55 = tpu.matmul %53, %7, %cst_20 {dimension_numbers = #tpu.dot_dimension_numbers<[1], [0], [0], [1], [0, 0, 1, 1], [], []>} : vector<8x32xf32>, vector<32x96xf32>, vector<8x96xf32> -> vector<8x96xf32>
    %56 = arith.addf %55, %10 : vector<8x96xf32>
    %57 = vector.extract_strided_slice %54 {offsets = [0, 0], sizes = [8, 64], strides = [1, 1]} : vector<8x96xf32> to vector<8x64xf32>
    %58 = vector.extract_strided_slice %56 {offsets = [0, 0], sizes = [8, 64], strides = [1, 1]} : vector<8x96xf32> to vector<8x64xf32>
    %59 = arith.addf %57, %58 : vector<8x64xf32>
    %60 = arith.negf %59 : vector<8x64xf32>
    %61 = math.exp %60 : vector<8x64xf32>
    %cst_21 = arith.constant 1.000000e+00 : f32
    %62 = vector.broadcast %cst_21 : f32 to vector<8x64xf32>
    %63 = arith.addf %62, %61 : vector<8x64xf32>
    %64 = arith.divf %62, %63 : vector<8x64xf32>
    %65 = vector.extract_strided_slice %64 {offsets = [0, 0], sizes = [8, 32], strides = [1, 1]} : vector<8x64xf32> to vector<8x32xf32>
    %66 = vector.extract_strided_slice %64 {offsets = [0, 32], sizes = [8, 32], strides = [1, 1]} : vector<8x64xf32> to vector<8x32xf32>
    %67 = vector.extract_strided_slice %54 {offsets = [0, 64], sizes = [8, 32], strides = [1, 1]} : vector<8x96xf32> to vector<8x32xf32>
    %68 = vector.extract_strided_slice %56 {offsets = [0, 64], sizes = [8, 32], strides = [1, 1]} : vector<8x96xf32> to vector<8x32xf32>
    %69 = arith.mulf %65, %68 : vector<8x32xf32>
    %70 = arith.addf %67, %69 : vector<8x32xf32>
    %71 = math.tanh %70 : vector<8x32xf32>
    %72 = arith.subf %53, %71 : vector<8x32xf32>
    %73 = arith.mulf %66, %72 : vector<8x32xf32>
    %74 = arith.addf %71, %73 : vector<8x32xf32>
    %c3 = arith.constant 3 : index
    %c0_22 = arith.constant 0 : index
    %75 = tpu.strided_load %arg7[%c3, %c0_22] {strides = array<i32: 8, 1>} : memref<64x96xf32, #tpu.memory_space<vmem>>, vector<8x96xf32>
    %cst_23 = arith.constant dense<0.000000e+00> : vector<8x96xf32>
    %76 = tpu.matmul %74, %7, %cst_23 {dimension_numbers = #tpu.dot_dimension_numbers<[1], [0], [0], [1], [0, 0, 1, 1], [], []>} : vector<8x32xf32>, vector<32x96xf32>, vector<8x96xf32> -> vector<8x96xf32>
    %77 = arith.addf %76, %10 : vector<8x96xf32>
    %78 = vector.extract_strided_slice %75 {offsets = [0, 0], sizes = [8, 64], strides = [1, 1]} : vector<8x96xf32> to vector<8x64xf32>
    %79 = vector.extract_strided_slice %77 {offsets = [0, 0], sizes = [8, 64], strides = [1, 1]} : vector<8x96xf32> to vector<8x64xf32>
    %80 = arith.addf %78, %79 : vector<8x64xf32>
    %81 = arith.negf %80 : vector<8x64xf32>
    %82 = math.exp %81 : vector<8x64xf32>
    %cst_24 = arith.constant 1.000000e+00 : f32
    %83 = vector.broadcast %cst_24 : f32 to vector<8x64xf32>
    %84 = arith.addf %83, %82 : vector<8x64xf32>
    %85 = arith.divf %83, %84 : vector<8x64xf32>
    %86 = vector.extract_strided_slice %85 {offsets = [0, 0], sizes = [8, 32], strides = [1, 1]} : vector<8x64xf32> to vector<8x32xf32>
    %87 = vector.extract_strided_slice %85 {offsets = [0, 32], sizes = [8, 32], strides = [1, 1]} : vector<8x64xf32> to vector<8x32xf32>
    %88 = vector.extract_strided_slice %75 {offsets = [0, 64], sizes = [8, 32], strides = [1, 1]} : vector<8x96xf32> to vector<8x32xf32>
    %89 = vector.extract_strided_slice %77 {offsets = [0, 64], sizes = [8, 32], strides = [1, 1]} : vector<8x96xf32> to vector<8x32xf32>
    %90 = arith.mulf %86, %89 : vector<8x32xf32>
    %91 = arith.addf %88, %90 : vector<8x32xf32>
    %92 = math.tanh %91 : vector<8x32xf32>
    %93 = arith.subf %74, %92 : vector<8x32xf32>
    %94 = arith.mulf %87, %93 : vector<8x32xf32>
    %95 = arith.addf %92, %94 : vector<8x32xf32>
    %c4 = arith.constant 4 : index
    %c0_25 = arith.constant 0 : index
    %96 = tpu.strided_load %arg7[%c4, %c0_25] {strides = array<i32: 8, 1>} : memref<64x96xf32, #tpu.memory_space<vmem>>, vector<8x96xf32>
    %cst_26 = arith.constant dense<0.000000e+00> : vector<8x96xf32>
    %97 = tpu.matmul %95, %7, %cst_26 {dimension_numbers = #tpu.dot_dimension_numbers<[1], [0], [0], [1], [0, 0, 1, 1], [], []>} : vector<8x32xf32>, vector<32x96xf32>, vector<8x96xf32> -> vector<8x96xf32>
    %98 = arith.addf %97, %10 : vector<8x96xf32>
    %99 = vector.extract_strided_slice %96 {offsets = [0, 0], sizes = [8, 64], strides = [1, 1]} : vector<8x96xf32> to vector<8x64xf32>
    %100 = vector.extract_strided_slice %98 {offsets = [0, 0], sizes = [8, 64], strides = [1, 1]} : vector<8x96xf32> to vector<8x64xf32>
    %101 = arith.addf %99, %100 : vector<8x64xf32>
    %102 = arith.negf %101 : vector<8x64xf32>
    %103 = math.exp %102 : vector<8x64xf32>
    %cst_27 = arith.constant 1.000000e+00 : f32
    %104 = vector.broadcast %cst_27 : f32 to vector<8x64xf32>
    %105 = arith.addf %104, %103 : vector<8x64xf32>
    %106 = arith.divf %104, %105 : vector<8x64xf32>
    %107 = vector.extract_strided_slice %106 {offsets = [0, 0], sizes = [8, 32], strides = [1, 1]} : vector<8x64xf32> to vector<8x32xf32>
    %108 = vector.extract_strided_slice %106 {offsets = [0, 32], sizes = [8, 32], strides = [1, 1]} : vector<8x64xf32> to vector<8x32xf32>
    %109 = vector.extract_strided_slice %96 {offsets = [0, 64], sizes = [8, 32], strides = [1, 1]} : vector<8x96xf32> to vector<8x32xf32>
    %110 = vector.extract_strided_slice %98 {offsets = [0, 64], sizes = [8, 32], strides = [1, 1]} : vector<8x96xf32> to vector<8x32xf32>
    %111 = arith.mulf %107, %110 : vector<8x32xf32>
    %112 = arith.addf %109, %111 : vector<8x32xf32>
    %113 = math.tanh %112 : vector<8x32xf32>
    %114 = arith.subf %95, %113 : vector<8x32xf32>
    %115 = arith.mulf %108, %114 : vector<8x32xf32>
    %116 = arith.addf %113, %115 : vector<8x32xf32>
    %c5 = arith.constant 5 : index
    %c0_28 = arith.constant 0 : index
    %117 = tpu.strided_load %arg7[%c5, %c0_28] {strides = array<i32: 8, 1>} : memref<64x96xf32, #tpu.memory_space<vmem>>, vector<8x96xf32>
    %cst_29 = arith.constant dense<0.000000e+00> : vector<8x96xf32>
    %118 = tpu.matmul %116, %7, %cst_29 {dimension_numbers = #tpu.dot_dimension_numbers<[1], [0], [0], [1], [0, 0, 1, 1], [], []>} : vector<8x32xf32>, vector<32x96xf32>, vector<8x96xf32> -> vector<8x96xf32>
    %119 = arith.addf %118, %10 : vector<8x96xf32>
    %120 = vector.extract_strided_slice %117 {offsets = [0, 0], sizes = [8, 64], strides = [1, 1]} : vector<8x96xf32> to vector<8x64xf32>
    %121 = vector.extract_strided_slice %119 {offsets = [0, 0], sizes = [8, 64], strides = [1, 1]} : vector<8x96xf32> to vector<8x64xf32>
    %122 = arith.addf %120, %121 : vector<8x64xf32>
    %123 = arith.negf %122 : vector<8x64xf32>
    %124 = math.exp %123 : vector<8x64xf32>
    %cst_30 = arith.constant 1.000000e+00 : f32
    %125 = vector.broadcast %cst_30 : f32 to vector<8x64xf32>
    %126 = arith.addf %125, %124 : vector<8x64xf32>
    %127 = arith.divf %125, %126 : vector<8x64xf32>
    %128 = vector.extract_strided_slice %127 {offsets = [0, 0], sizes = [8, 32], strides = [1, 1]} : vector<8x64xf32> to vector<8x32xf32>
    %129 = vector.extract_strided_slice %127 {offsets = [0, 32], sizes = [8, 32], strides = [1, 1]} : vector<8x64xf32> to vector<8x32xf32>
    %130 = vector.extract_strided_slice %117 {offsets = [0, 64], sizes = [8, 32], strides = [1, 1]} : vector<8x96xf32> to vector<8x32xf32>
    %131 = vector.extract_strided_slice %119 {offsets = [0, 64], sizes = [8, 32], strides = [1, 1]} : vector<8x96xf32> to vector<8x32xf32>
    %132 = arith.mulf %128, %131 : vector<8x32xf32>
    %133 = arith.addf %130, %132 : vector<8x32xf32>
    %134 = math.tanh %133 : vector<8x32xf32>
    %135 = arith.subf %116, %134 : vector<8x32xf32>
    %136 = arith.mulf %129, %135 : vector<8x32xf32>
    %137 = arith.addf %134, %136 : vector<8x32xf32>
    %c6 = arith.constant 6 : index
    %c0_31 = arith.constant 0 : index
    %138 = tpu.strided_load %arg7[%c6, %c0_31] {strides = array<i32: 8, 1>} : memref<64x96xf32, #tpu.memory_space<vmem>>, vector<8x96xf32>
    %cst_32 = arith.constant dense<0.000000e+00> : vector<8x96xf32>
    %139 = tpu.matmul %137, %7, %cst_32 {dimension_numbers = #tpu.dot_dimension_numbers<[1], [0], [0], [1], [0, 0, 1, 1], [], []>} : vector<8x32xf32>, vector<32x96xf32>, vector<8x96xf32> -> vector<8x96xf32>
    %140 = arith.addf %139, %10 : vector<8x96xf32>
    %141 = vector.extract_strided_slice %138 {offsets = [0, 0], sizes = [8, 64], strides = [1, 1]} : vector<8x96xf32> to vector<8x64xf32>
    %142 = vector.extract_strided_slice %140 {offsets = [0, 0], sizes = [8, 64], strides = [1, 1]} : vector<8x96xf32> to vector<8x64xf32>
    %143 = arith.addf %141, %142 : vector<8x64xf32>
    %144 = arith.negf %143 : vector<8x64xf32>
    %145 = math.exp %144 : vector<8x64xf32>
    %cst_33 = arith.constant 1.000000e+00 : f32
    %146 = vector.broadcast %cst_33 : f32 to vector<8x64xf32>
    %147 = arith.addf %146, %145 : vector<8x64xf32>
    %148 = arith.divf %146, %147 : vector<8x64xf32>
    %149 = vector.extract_strided_slice %148 {offsets = [0, 0], sizes = [8, 32], strides = [1, 1]} : vector<8x64xf32> to vector<8x32xf32>
    %150 = vector.extract_strided_slice %148 {offsets = [0, 32], sizes = [8, 32], strides = [1, 1]} : vector<8x64xf32> to vector<8x32xf32>
    %151 = vector.extract_strided_slice %138 {offsets = [0, 64], sizes = [8, 32], strides = [1, 1]} : vector<8x96xf32> to vector<8x32xf32>
    %152 = vector.extract_strided_slice %140 {offsets = [0, 64], sizes = [8, 32], strides = [1, 1]} : vector<8x96xf32> to vector<8x32xf32>
    %153 = arith.mulf %149, %152 : vector<8x32xf32>
    %154 = arith.addf %151, %153 : vector<8x32xf32>
    %155 = math.tanh %154 : vector<8x32xf32>
    %156 = arith.subf %137, %155 : vector<8x32xf32>
    %157 = arith.mulf %150, %156 : vector<8x32xf32>
    %158 = arith.addf %155, %157 : vector<8x32xf32>
    %c7 = arith.constant 7 : index
    %c0_34 = arith.constant 0 : index
    %159 = tpu.strided_load %arg7[%c7, %c0_34] {strides = array<i32: 8, 1>} : memref<64x96xf32, #tpu.memory_space<vmem>>, vector<8x96xf32>
    %cst_35 = arith.constant dense<0.000000e+00> : vector<8x96xf32>
    %160 = tpu.matmul %158, %7, %cst_35 {dimension_numbers = #tpu.dot_dimension_numbers<[1], [0], [0], [1], [0, 0, 1, 1], [], []>} : vector<8x32xf32>, vector<32x96xf32>, vector<8x96xf32> -> vector<8x96xf32>
    %161 = arith.addf %160, %10 : vector<8x96xf32>
    %162 = vector.extract_strided_slice %159 {offsets = [0, 0], sizes = [8, 64], strides = [1, 1]} : vector<8x96xf32> to vector<8x64xf32>
    %163 = vector.extract_strided_slice %161 {offsets = [0, 0], sizes = [8, 64], strides = [1, 1]} : vector<8x96xf32> to vector<8x64xf32>
    %164 = arith.addf %162, %163 : vector<8x64xf32>
    %165 = arith.negf %164 : vector<8x64xf32>
    %166 = math.exp %165 : vector<8x64xf32>
    %cst_36 = arith.constant 1.000000e+00 : f32
    %167 = vector.broadcast %cst_36 : f32 to vector<8x64xf32>
    %168 = arith.addf %167, %166 : vector<8x64xf32>
    %169 = arith.divf %167, %168 : vector<8x64xf32>
    %170 = vector.extract_strided_slice %169 {offsets = [0, 0], sizes = [8, 32], strides = [1, 1]} : vector<8x64xf32> to vector<8x32xf32>
    %171 = vector.extract_strided_slice %169 {offsets = [0, 32], sizes = [8, 32], strides = [1, 1]} : vector<8x64xf32> to vector<8x32xf32>
    %172 = vector.extract_strided_slice %159 {offsets = [0, 64], sizes = [8, 32], strides = [1, 1]} : vector<8x96xf32> to vector<8x32xf32>
    %173 = vector.extract_strided_slice %161 {offsets = [0, 64], sizes = [8, 32], strides = [1, 1]} : vector<8x96xf32> to vector<8x32xf32>
    %174 = arith.mulf %170, %173 : vector<8x32xf32>
    %175 = arith.addf %172, %174 : vector<8x32xf32>
    %176 = math.tanh %175 : vector<8x32xf32>
    %177 = arith.subf %158, %176 : vector<8x32xf32>
    %178 = arith.mulf %171, %177 : vector<8x32xf32>
    %179 = arith.addf %176, %178 : vector<8x32xf32>
    %c0_37 = arith.constant 0 : index
    %c0_38 = arith.constant 0 : index
    %180 = vector.load %arg4[%c0_37, %c0_38] : memref<32x64xf32, #tpu.memory_space<vmem>>, vector<32x64xf32>
    %cst_39 = arith.constant dense<0.000000e+00> : vector<8x64xf32>
    %181 = tpu.matmul %179, %180, %cst_39 {dimension_numbers = #tpu.dot_dimension_numbers<[1], [0], [0], [1], [0, 0, 1, 1], [], []>} : vector<8x32xf32>, vector<32x64xf32>, vector<8x64xf32> -> vector<8x64xf32>
    %c0_40 = arith.constant 0 : index
    %c0_41 = arith.constant 0 : index
    %182 = vector.load %arg5[%c0_40, %c0_41] : memref<1x64xf32, #tpu.memory_space<vmem>>, vector<1x64xf32>
    %183 = vector.broadcast %182 : vector<1x64xf32> to vector<8x64xf32>
    %184 = arith.addf %181, %183 : vector<8x64xf32>
    %185 = tpu.iota {dimensions = array<i32: 1>} : vector<8x64xi32>
    %c32_i32 = arith.constant 32 : i32
    %186 = vector.broadcast %c32_i32 : i32 to vector<8x64xi32>
    %187 = arith.cmpi slt, %185, %186 : vector<8x64xi32>
    %cst_42 = arith.constant 2.000000e+01 : f32
    %188 = vector.broadcast %cst_42 : f32 to vector<8x64xf32>
    %189 = arith.cmpf ogt, %184, %188 : vector<8x64xf32>
    %cst_43 = arith.constant 2.000000e+01 : f32
    %190 = vector.broadcast %cst_43 : f32 to vector<8x64xf32>
    %191 = arith.minimumf %184, %190 : vector<8x64xf32>
    %192 = math.exp %191 : vector<8x64xf32>
    %193 = math.log1p %192 : vector<8x64xf32>
    %194 = arith.select %189, %184, %193 : vector<8x64xi1>, vector<8x64xf32>
    %195 = arith.select %187, %184, %194 : vector<8x64xi1>, vector<8x64xf32>
    %c0_44 = arith.constant 0 : index
    %c0_45 = arith.constant 0 : index
    %196 = vector.load %arg6[%c0_44, %c0_45] : memref<8x64xf32, #tpu.memory_space<vmem>>, vector<8x64xf32>
    tpu.vector_store %arg6[%c0_44, %c0_45], %195 {strides = array<i32>} : memref<8x64xf32, #tpu.memory_space<vmem>>, vector<8x64xf32>,
    return
  }
}

</mosaic_0001>

<bundles_post_ra>
// kernel: gru_encoder_forward.1
= control target key start
LH: loop header
LB: loop body
LE: loop exit
PB: predicated region body
PF: predicated region fallthrough
CT: control target
= control target key end

     0   :  { %vm37_vm0 = vcmask 261120   ;;  %v831_v13 = vmov 0.0   ;;  %vm103_vm1 = vcmask 785408   ;;  %s834_s7 = smov 32   ;;  %s1056_s1 = inlined_call_operand.vmem [shape: f32[32,96], index: 1, kind: input, shape index: {}]   ;;  %s1057_s2 = inlined_call_operand.vmem [shape: f32[32,96], index: 2, kind: input, shape index: {}]   ;;  %s1058_s0 = inlined_call_operand.vmem [shape: f32[64,32], index: 0, kind: input, shape index: {}]   ;;  %s1059_s3 = inlined_call_operand.vmem [shape: f32[2,96], index: 3, kind: input, shape index: {}]   ;;  %s1060_s4 = inlined_call_operand.vmem [shape: f32[32,64], index: 4, kind: input, shape index: {}]   ;;  %s1061_s5 = inlined_call_operand.vmem [shape: f32[1,64], index: 5, kind: input, shape index: {}]   ;;  %s1062_s6 = inlined_call_operand.vmem [shape: f32[8,64], index: 6, kind: output, shape index: {}]  }
   0x1   :  { %v34_v0 = vld [vmem:[%s1056_s1 + $0x18] sm:$0xff]  ;;  %v33_v1 = vld [vmem:[%s1056_s1 + $0x10] sm:$0xff]  ;;  %v32_v2 = vld [vmem:[%s1056_s1 + $0x8] sm:$0xff] }
   0x2   :  { %74 = vmatpush.msra.mxu0 %v34_v0  ;;  %764 = vmatpush.msra.mxu1 %v34_v0  ;;  %v882_v3 = vld [vmem:[%s1057_s2 + $0x18] sm:$0xff]  ;;  %v31_v4 = vld [vmem:[%s1056_s1] sm:$0xff]  ;;  %v28_v6 = vld [vmem:[%s1058_s0 + $0x28] sm:$0xff] }
   0x3   :  { %765 = vmatpush.msra.mxu2 %v34_v0  ;;  %v23_v5 = vld [vmem:[%s1058_s0] sm:$0xff]  ;;  %278 = vmatpush.msra.mxu3 %v882_v3  ;;  %v897_v7 = vld [vmem:[%s1057_s2 + $0x10] sm:$0xff]  ;;  %v909_v9 = vld [vmem:[%s1057_s2 + $0x8] sm:$0xff] }
   0x4   :  { %75 = vmatpush.msra.mxu0 %v33_v1  ;;  %766 = vmatpush.msra.mxu1 %v33_v1  ;;  %v29_v8 = vld [vmem:[%s1058_s0 + $0x30] sm:$0xff]  ;;  %v917_v10 = vld [vmem:[%s1057_s2] sm:$0xff]  ;;  %v24_v11 = vld [vmem:[%s1058_s0 + $0x8] sm:$0xff] }
   0x5   :  { %767 = vmatpush.msra.mxu2 %v33_v1  ;;  %279 = vmatpush.msra.mxu3 %v897_v7  ;;  %v30_v12 = vld [vmem:[%s1058_s0 + $0x38] sm:$0xff]  ;;  %v25_v14 = vld [vmem:[%s1058_s0 + $0x10] sm:$0xff]  ;;  %v27_v16 = vld [vmem:[%s1058_s0 + $0x20] sm:$0xff] }
   0x6   :  { %76 = vmatpush.msra.mxu0 %v32_v2  ;;  %768 = vmatpush.msra.mxu1 %v32_v2  ;;  %v26_v15 = vld [vmem:[%s1058_s0 + $0x18] sm:$0xff]  ;;  %v776_v17 = vld [vmem:[%s1059_s3] ss:$0 sm:$0xff]  ;;  %v970_v22 = vld [vmem:[%s1059_s3 + $0x1] ss:$0 sm:$0xff]  ;;  %s832_s0 = smov 64  }
   0x7   :  { %769 = vmatpush.msra.mxu2 %v32_v2  ;;  %280 = vmatpush.msra.mxu3 %v909_v9  ;;  %s833_s3 = smov 96  }
   0x8   :  { %77 = vmatpush.msra.mxu0 %v31_v4  ;;  %770 = vmatpush.msra.mxu1 %v31_v4 }
   0x9   :  { %740 = vmatmul.msk.f32.vlgmr.msra.gmra.mxu0 %vm37_vm0, %v23_v5  ;;  %745 = vmatmul.msk.f32.vlgmr.msra.gmra.mxu1 %vm37_vm0, %v28_v6 }
   0xa   :  { %136 = vmatpush.msrb.mxu1 %v882_v3  ;;  %771 = vmatpush.msra.mxu2 %v31_v4 }
   0xb   :  { %746 = vmatmul.msk.f32.vlgmr.msra.gmra.mxu2 %vm37_vm0, %v29_v8  ;;  %281 = vmatpush.msra.mxu3 %v917_v10 }
   0xc   :  { %137 = vmatpush.msrb.mxu1 %v897_v7  ;;  %207 = vmatpush.msrb.mxu2 %v882_v3 }
   0xd   :  { %491 = vmatpush.msrb.mxu3 %v882_v3 }
   0xe   :  { %138 = vmatpush.msrb.mxu1 %v909_v9  ;;  %208 = vmatpush.msrb.mxu2 %v897_v7 }
   0xf   :  { %492 = vmatpush.msrb.mxu3 %v897_v7 }
  0x10   :  { %139 = vmatpush.msrb.mxu1 %v917_v10  ;;  %209 = vmatpush.msrb.mxu2 %v909_v9 }
  0x11   :  { %741 = vmatmul.msk.f32.gmra.mxu0 %vm37_vm0, %v24_v11  ;;  %140 = vmatmul.f32.vlgmr.msrb.gmra.mxu1 %v831_v13 }
  0x12   :  { %210 = vmatpush.msrb.mxu2 %v917_v10  ;;  %349 = vmatpush.msra.mxu1 %v882_v3 }
  0x13   :  { %747 = vmatmul.msk.f32.gmra.mxu2 %vm37_vm0, %v30_v12  ;;  %493 = vmatpush.msrb.mxu3 %v909_v9 }
  0x14   :  { %350 = vmatpush.msra.mxu1 %v897_v7  ;;  %420 = vmatpush.msra.mxu2 %v882_v3 }
  0x15   :  { %494 = vmatpush.msrb.mxu3 %v917_v10 }
  0x16   :  { %351 = vmatpush.msra.mxu1 %v909_v9  ;;  %421 = vmatpush.msra.mxu2 %v897_v7 }
  0x18   :  { %352 = vmatpush.msra.mxu1 %v917_v10  ;;  %422 = vmatpush.msra.mxu2 %v909_v9 }
  0x19   :  { %742 = vmatmul.msk.f32.gmra.mxu0 %vm37_vm0, %v25_v14 }
  0x1a   :  { %562 = vmatpush.msrb.mxu1 %v882_v3  ;;  %423 = vmatpush.msra.mxu2 %v917_v10 }
  0x1c   :  { %563 = vmatpush.msrb.mxu1 %v897_v7 }
  0x1e   :  { %564 = vmatpush.msrb.mxu1 %v909_v9 }
  0x20   :  { %565 = vmatpush.msrb.mxu1 %v917_v10 }
  0x21   :  { %743 = vmatmul.msk.f32.gmra.mxu0 %vm37_vm0, %v26_v15 }
  0x29   :  { %744 = vmatmul.msk.f32.gmra.mxu0 %vm37_vm0, %v27_v16 }
  0x86   :  { %v79_v18 = vpop.f32.mrf.mxu0  ;;  %v94_v19 = vpop.f32.mrf.mxu1 }
  0x87   :  { %v80_v20 = vadd.f32 %v776_v17, %v79_v18  ;;  %v95_v21 = vadd.f32 %v776_v17, %v94_v19 }
  0x89   :  { %104 = vst.msk [vmem:[#allocation2] sm:$0xff] %vm103_vm1, %v80_v20 }
  0x8a   :  { %109 = vst.msk [vmem:[#allocation2 + $0x28] sm:$0xff] %vm103_vm1, %v95_v21 }
  0x8e   :  { %v82_v23 = vpop.f32.mrf.mxu0  ;;  %v141_v24 = vpop.f32.mrf.mxu1 }
  0x8f   :  { %v83_v25 = vadd.f32 %v776_v17, %v82_v23  ;;  %v142_v26 = vadd.f32 %v970_v22, %v141_v24  ;;  %v97_v27 = vpop.f32.mrf.mxu2 }
  0x90   :  { %v98_v28 = vadd.f32 %v776_v17, %v97_v27 }
  0x91   :  { %105 = vst.msk [vmem:[#allocation2 + $0x8] sm:$0xff] %vm103_vm1, %v83_v25  ;;  %165 = vrot.lane.b32.xlu0 %v142_v26, %s832_s0 }
  0x92   :  { %110 = vst.msk [vmem:[#allocation2 + $0x30] sm:$0xff] %vm103_vm1, %v98_v28 }
  0x96   :  { %v85_v29 = vpop.f32.mrf.mxu0 }
  0x97   :  { %v86_v30 = vadd.f32 %v776_v17, %v85_v29  ;;  %v100_v31 = vpop.f32.mrf.mxu2 }
  0x98   :  { %v101_v32 = vadd.f32 %v776_v17, %v100_v31 }
  0x99   :  { %106 = vst.msk [vmem:[#allocation2 + $0x10] sm:$0xff] %vm103_vm1, %v86_v30 }
  0x9a   :  { %111 = vst.msk [vmem:[#allocation2 + $0x38] sm:$0xff] %vm103_vm1, %v101_v32 }
  0x9e   :  { %v88_v33 = vpop.f32.mrf.mxu0 }
  0x9f   :  { %v89_v34 = vadd.f32 %v776_v17, %v88_v33 }
  0xa1   :  { %107 = vst.msk [vmem:[#allocation2 + $0x18] sm:$0xff] %vm103_vm1, %v89_v34 }
  0xa6   :  { %v91_v35 = vpop.f32.mrf.mxu0 }
  0xa7   :  { %v92_v36 = vadd.f32 %v776_v17, %v91_v35 }
  0xa8   :  { %v118_v37 = vld [vmem:[#allocation2] ss:$8 sm:$0xf]  ;;  %v187_v4 = vld [vmem:[#allocation2 + $0x1] ss:$8 sm:$0xf] }
  0xa9   :  { %108 = vst.msk [vmem:[#allocation2 + $0x20] sm:$0xff] %vm103_vm1, %v92_v36  ;;  %v258_v34 = vld [vmem:[#allocation2 + $0x2] ss:$8 sm:$0xf] }
  0xb0   :  { %v119_v38 = vld [vmem:[#allocation2] ss:$8 sm:$0xf0]  ;;  %v188_v5 = vld [vmem:[#allocation2 + $0x1] ss:$8 sm:$0xf0] }
  0xb1   :  { %v120_v39 = vor.u32 %v119_v38, %v118_v37  ;;  %v189_v6 = vor.u32 %v188_v5, %v187_v4  ;;  %v259_v35 = vld [vmem:[#allocation2 + $0x2] ss:$8 sm:$0xf0] }
  0xb2   :  { %v260_v36 = vor.u32 %v259_v35, %v258_v34 }
  0xb3   :  { %v144_v40 = vadd.f32 %v142_v26, %v120_v39 }
  0xb5   :  { %v748_v41 = vmul.f32 -1.442695, %v144_v40 }
  0xb7   :  { %779 = vpow2.f32 %v748_v41 }
  0xbd   :  { %v780_v42 = vpop.eup %779 }
  0xbe   :  { %v148_v43 = vadd.f32 1.0, %v780_v42 }
  0xc0   :  { %781 = vrcp.f32 %v148_v43  ;;  %v160_v49 = vand.u32 2147483648, %v148_v43  ;;  %vm154_vm3 = vweird.f32 %v148_v43  ;;  %v158_v50 = vand.u32 2147483647, %v148_v43 }
  0xc2   :  { %v161_v52 = vor.u32 1.1754944e-38, %v160_v49  ;;  %vm159_vm5 = vcmp.eq.f32.partialorder %v158_v50, 8.507059e+37 }
  0xc6   :  { %v782_v44 = vpop.eup %781 }
  0xc7   :  { %v150_v45 = vmul.f32 %v782_v44, %v148_v43  ;;  %vm155_vm2 = vweird.f32 %v782_v44 }
  0xc8   :  { %vm156_vm4 = vmor %vm154_vm3, %vm155_vm2 }
  0xc9   :  { %v151_v46 = vsub.f32 1.0, %v150_v45 }
  0xcb   :  { %v152_v47 = vmul.f32 %v782_v44, %v151_v46 }
  0xcd   :  { %v153_v48 = vadd.f32 %v782_v44, %v152_v47 }
  0xcf   :  { %v157_v51 = vsel %vm156_vm4, %v782_v44, %v153_v48 }
  0xd0   :  { %v162_v54 = vsel %vm159_vm5, %v161_v52, %v157_v51 }
 0x103   :  { %v166_v53 = vpop.permute.xlu0 %165 }
 0x104   :  { %v168_v55 = vmul.f32 %v166_v53, %v162_v54 }
 0x106   :  { %170 = vrot.lane.b32.xlu0 %v168_v55, %s832_s0 }
 0x178   :  { %v171_v56 = vpop.permute.xlu0 %170 }
 0x179   :  { %v173_v57 = vadd.f32 %v171_v56, %v120_v39 }
 0x17b   :  { %783 = vtanh.f32 %v173_v57 }
 0x181   :  { %v784_v58 = vpop.eup %783 }
 0x182   :  { %v175_v59 = vsub.f32 0.0, %v784_v58 }
 0x184   :  { %177 = vrot.lane.b32.xlu1 %v175_v59, %s833_s3 }
 0x1f6   :  { %v178_v60 = vpop.permute.xlu1 %177 }
 0x1f7   :  { %v180_v61 = vmul.f32 %v178_v60, %v162_v54 }
 0x1f9   :  { %182 = vrot.lane.b32.xlu1 %v180_v61, %s834_s7 }
 0x26b   :  { %v183_v62 = vpop.permute.xlu1 %182 }
 0x26c   :  { %v185_v63 = vadd.f32 %v784_v58, %v183_v62 }
 0x26e   :  { %191 = vrot.lane.b32.xlu2 %v185_v63, %s832_s0 }
 0x2c8   :  { %v192_v0 = vpop.permute.xlu2 %191 }
 0x2c9   :  { %749 = vmatmul.msk.f32.vlgmr.msrb.gmra.mxu2 %vm37_vm0, %v192_v0  ;;  %v329_v0 = vld [vmem:[#allocation2 + $0x3] ss:$8 sm:$0xf] }
 0x2ca   :  { %633 = vmatpush.msrb.mxu2 %v882_v3 }
 0x2cc   :  { %634 = vmatpush.msrb.mxu2 %v897_v7 }
 0x2ce   :  { %635 = vmatpush.msrb.mxu2 %v909_v9 }
 0x2d0   :  { %636 = vmatpush.msrb.mxu2 %v917_v10 }
 0x34c   :  { %v212_v1 = vpop.f32.mrf.mxu2 }
 0x34d   :  { %v213_v2 = vadd.f32 %v970_v22, %v212_v1  ;;  %v330_v1 = vld [vmem:[#allocation2 + $0x3] ss:$8 sm:$0xf0] }
 0x34f   :  { %236 = vrot.lane.b32.xlu2 %v213_v2, %s832_s0  ;;  %v215_v8 = vadd.f32 %v213_v2, %v189_v6  ;;  %v331_v2 = vor.u32 %v330_v1, %v329_v0 }
 0x351   :  { %v750_v11 = vmul.f32 -1.442695, %v215_v8 }
 0x353   :  { %785 = vpow2.f32 %v750_v11 }
 0x359   :  { %v786_v12 = vpop.eup %785 }
 0x35a   :  { %v219_v13 = vadd.f32 1.0, %v786_v12 }
 0x35c   :  { %787 = vrcp.f32 %v219_v13  ;;  %v231_v10 = vand.u32 2147483648, %v219_v13  ;;  %vm225_vm7 = vweird.f32 %v219_v13  ;;  %v229_v16 = vand.u32 2147483647, %v219_v13 }
 0x35e   :  { %v232_v18 = vor.u32 1.1754944e-38, %v231_v10  ;;  %vm230_vm9 = vcmp.eq.f32.partialorder %v229_v16, 8.507059e+37 }
 0x362   :  { %v788_v3 = vpop.eup %787 }
 0x363   :  { %v221_v7 = vmul.f32 %v788_v3, %v219_v13  ;;  %vm226_vm6 = vweird.f32 %v788_v3 }
 0x364   :  { %vm227_vm8 = vmor %vm225_vm7, %vm226_vm6 }
 0x365   :  { %v222_v14 = vsub.f32 1.0, %v221_v7 }
 0x367   :  { %v223_v9 = vmul.f32 %v788_v3, %v222_v14 }
 0x369   :  { %v224_v15 = vadd.f32 %v788_v3, %v223_v9 }
 0x36b   :  { %v228_v17 = vsel %vm227_vm8, %v788_v3, %v224_v15 }
 0x36c   :  { %v233_v20 = vsel %vm230_vm9, %v232_v18, %v228_v17 }
 0x3a9   :  { %v237_v19 = vpop.permute.xlu2 %236 }
 0x3aa   :  { %v239_v21 = vmul.f32 %v237_v19, %v233_v20 }
 0x3ac   :  { %241 = vrot.lane.b32.xlu0 %v239_v21, %s832_s0 }
 0x41e   :  { %v242_v23 = vpop.permute.xlu0 %241 }
 0x41f   :  { %v244_v24 = vadd.f32 %v242_v23, %v189_v6 }
 0x421   :  { %789 = vtanh.f32 %v244_v24 }
 0x427   :  { %v790_v25 = vpop.eup %789 }
 0x428   :  { %v246_v26 = vsub.f32 %v185_v63, %v790_v25 }
 0x42a   :  { %248 = vrot.lane.b32.xlu1 %v246_v26, %s833_s3 }
 0x49c   :  { %v249_v27 = vpop.permute.xlu1 %248 }
 0x49d   :  { %v251_v28 = vmul.f32 %v249_v27, %v233_v20 }
 0x49f   :  { %253 = vrot.lane.b32.xlu2 %v251_v28, %s834_s7 }
 0x4f9   :  { %v254_v29 = vpop.permute.xlu2 %253 }
 0x4fa   :  { %v256_v30 = vadd.f32 %v790_v25, %v254_v29 }
 0x4fc   :  { %262 = vrot.lane.b32.xlu0 %v256_v30, %s832_s0 }
 0x56e   :  { %v263_v31 = vpop.permute.xlu0 %262 }
 0x56f   :  { %751 = vmatmul.msk.f32.vlgmr.msra.gmra.mxu3 %vm37_vm0, %v263_v31  ;;  %v400_v31 = vld [vmem:[#allocation2 + $0x4] ss:$8 sm:$0xf] }
 0x5f2   :  { %v283_v32 = vpop.f32.mrf.mxu3 }
 0x5f3   :  { %v284_v33 = vadd.f32 %v970_v22, %v283_v32  ;;  %v401_v32 = vld [vmem:[#allocation2 + $0x4] ss:$8 sm:$0xf0] }
 0x5f5   :  { %307 = vrot.lane.b32.xlu1 %v284_v33, %s832_s0  ;;  %v286_v37 = vadd.f32 %v284_v33, %v260_v36  ;;  %v402_v33 = vor.u32 %v401_v32, %v400_v31 }
 0x5f7   :  { %v752_v38 = vmul.f32 -1.442695, %v286_v37 }
 0x5f9   :  { %791 = vpow2.f32 %v752_v38 }
 0x5ff   :  { %v792_v39 = vpop.eup %791 }
 0x600   :  { %v290_v40 = vadd.f32 1.0, %v792_v39 }
 0x602   :  { %793 = vrcp.f32 %v290_v40  ;;  %v302_v46 = vand.u32 2147483648, %v290_v40  ;;  %vm296_vm11 = vweird.f32 %v290_v40  ;;  %v300_v47 = vand.u32 2147483647, %v290_v40 }
 0x604   :  { %v303_v49 = vor.u32 1.1754944e-38, %v302_v46  ;;  %vm301_vm13 = vcmp.eq.f32.partialorder %v300_v47, 8.507059e+37 }
 0x608   :  { %v794_v41 = vpop.eup %793 }
 0x609   :  { %v292_v42 = vmul.f32 %v794_v41, %v290_v40  ;;  %vm297_vm10 = vweird.f32 %v794_v41 }
 0x60a   :  { %vm298_vm12 = vmor %vm296_vm11, %vm297_vm10 }
 0x60b   :  { %v293_v43 = vsub.f32 1.0, %v292_v42 }
 0x60d   :  { %v294_v44 = vmul.f32 %v794_v41, %v293_v43 }
 0x60f   :  { %v295_v45 = vadd.f32 %v794_v41, %v294_v44 }
 0x611   :  { %v299_v48 = vsel %vm298_vm12, %v794_v41, %v295_v45 }
 0x612   :  { %v304_v51 = vsel %vm301_vm13, %v303_v49, %v299_v48 }
 0x667   :  { %v308_v50 = vpop.permute.xlu1 %307 }
 0x668   :  { %v310_v52 = vmul.f32 %v308_v50, %v304_v51 }
 0x66a   :  { %312 = vrot.lane.b32.xlu2 %v310_v52, %s832_s0 }
 0x6c4   :  { %v313_v53 = vpop.permute.xlu2 %312 }
 0x6c5   :  { %v315_v54 = vadd.f32 %v313_v53, %v260_v36 }
 0x6c7   :  { %795 = vtanh.f32 %v315_v54 }
 0x6cd   :  { %v796_v55 = vpop.eup %795 }
 0x6ce   :  { %v317_v56 = vsub.f32 %v256_v30, %v796_v55 }
 0x6d0   :  { %319 = vrot.lane.b32.xlu0 %v317_v56, %s833_s3 }
 0x742   :  { %v320_v57 = vpop.permute.xlu0 %319 }
 0x743   :  { %v322_v58 = vmul.f32 %v320_v57, %v304_v51 }
 0x745   :  { %324 = vrot.lane.b32.xlu1 %v322_v58, %s834_s7 }
 0x7b7   :  { %v325_v59 = vpop.permute.xlu1 %324 }
 0x7b8   :  { %v327_v60 = vadd.f32 %v796_v55, %v325_v59 }
 0x7ba   :  { %333 = vrot.lane.b32.xlu2 %v327_v60, %s832_s0 }
 0x814   :  { %v334_v61 = vpop.permute.xlu2 %333 }
 0x815   :  { %753 = vmatmul.msk.f32.vlgmr.msra.gmra.mxu1 %vm37_vm0, %v334_v61  ;;  %v471_v61 = vld [vmem:[#allocation2 + $0x5] ss:$8 sm:$0xf] }
 0x892   :  { %v354_v62 = vpop.f32.mrf.mxu1 }
 0x893   :  { %v355_v63 = vadd.f32 %v970_v22, %v354_v62  ;;  %v472_v62 = vld [vmem:[#allocation2 + $0x5] ss:$8 sm:$0xf0] }
 0x895   :  { %378 = vrot.lane.b32.xlu0 %v355_v63, %s832_s0  ;;  %v357_v4 = vadd.f32 %v355_v63, %v331_v2  ;;  %v473_v63 = vor.u32 %v472_v62, %v471_v61 }
 0x897   :  { %v754_v5 = vmul.f32 -1.442695, %v357_v4 }
 0x899   :  { %797 = vpow2.f32 %v754_v5 }
 0x89f   :  { %v798_v6 = vpop.eup %797 }
 0x8a0   :  { %v361_v8 = vadd.f32 1.0, %v798_v6 }
 0x8a2   :  { %799 = vrcp.f32 %v361_v8  ;;  %v373_v14 = vand.u32 2147483648, %v361_v8  ;;  %vm367_vm15 = vweird.f32 %v361_v8  ;;  %v371_v9 = vand.u32 2147483647, %v361_v8 }
 0x8a4   :  { %v374_v10 = vor.u32 1.1754944e-38, %v373_v14  ;;  %vm372_vm2 = vcmp.eq.f32.partialorder %v371_v9, 8.507059e+37 }
 0x8a8   :  { %v800_v11 = vpop.eup %799 }
 0x8a9   :  { %v363_v12 = vmul.f32 %v800_v11, %v361_v8  ;;  %vm368_vm14 = vweird.f32 %v800_v11 }
 0x8aa   :  { %vm369_vm1 = vmor %vm367_vm15, %vm368_vm14 }
 0x8ab   :  { %v364_v13 = vsub.f32 1.0, %v363_v12 }
 0x8ad   :  { %v365_v3 = vmul.f32 %v800_v11, %v364_v13 }
 0x8af   :  { %v366_v7 = vadd.f32 %v800_v11, %v365_v3 }
 0x8b1   :  { %v370_v15 = vsel %vm369_vm1, %v800_v11, %v366_v7 }
 0x8b2   :  { %v375_v17 = vsel %vm372_vm2, %v374_v10, %v370_v15 }
 0x907   :  { %v379_v16 = vpop.permute.xlu0 %378 }
 0x908   :  { %v381_v18 = vmul.f32 %v379_v16, %v375_v17 }
 0x90a   :  { %383 = vrot.lane.b32.xlu1 %v381_v18, %s832_s0 }
 0x97c   :  { %v384_v19 = vpop.permute.xlu1 %383 }
 0x97d   :  { %v386_v20 = vadd.f32 %v384_v19, %v331_v2 }
 0x97f   :  { %801 = vtanh.f32 %v386_v20 }
 0x985   :  { %v802_v21 = vpop.eup %801 }
 0x986   :  { %v388_v23 = vsub.f32 %v327_v60, %v802_v21 }
 0x988   :  { %390 = vrot.lane.b32.xlu2 %v388_v23, %s833_s3 }
 0x9e2   :  { %v391_v24 = vpop.permute.xlu2 %390 }
 0x9e3   :  { %v393_v25 = vmul.f32 %v391_v24, %v375_v17 }
 0x9e5   :  { %395 = vrot.lane.b32.xlu0 %v393_v25, %s834_s7 }
 0xa57   :  { %v396_v26 = vpop.permute.xlu0 %395 }
 0xa58   :  { %v398_v27 = vadd.f32 %v802_v21, %v396_v26 }
 0xa5a   :  { %404 = vrot.lane.b32.xlu1 %v398_v27, %s832_s0 }
 0xacc   :  { %v405_v28 = vpop.permute.xlu1 %404 }
 0xacd   :  { %755 = vmatmul.msk.f32.vlgmr.msra.gmra.mxu2 %vm37_vm0, %v405_v28  ;;  %v542_v28 = vld [vmem:[#allocation2 + $0x6] ss:$8 sm:$0xf] }
 0xb50   :  { %v425_v29 = vpop.f32.mrf.mxu2 }
 0xb51   :  { %v426_v30 = vadd.f32 %v970_v22, %v425_v29  ;;  %v543_v29 = vld [vmem:[#allocation2 + $0x6] ss:$8 sm:$0xf0] }
 0xb53   :  { %449 = vrot.lane.b32.xlu2 %v426_v30, %s832_s0  ;;  %v428_v34 = vadd.f32 %v426_v30, %v402_v33  ;;  %v544_v30 = vor.u32 %v543_v29, %v542_v28 }
 0xb55   :  { %v756_v35 = vmul.f32 -1.442695, %v428_v34 }
 0xb57   :  { %803 = vpow2.f32 %v756_v35 }
 0xb5d   :  { %v804_v36 = vpop.eup %803 }
 0xb5e   :  { %v432_v37 = vadd.f32 1.0, %v804_v36 }
 0xb60   :  { %805 = vrcp.f32 %v432_v37  ;;  %v444_v43 = vand.u32 2147483648, %v432_v37  ;;  %vm438_vm4 = vweird.f32 %v432_v37  ;;  %v442_v44 = vand.u32 2147483647, %v432_v37 }
 0xb62   :  { %v445_v46 = vor.u32 1.1754944e-38, %v444_v43  ;;  %vm443_vm6 = vcmp.eq.f32.partialorder %v442_v44, 8.507059e+37 }
 0xb66   :  { %v806_v38 = vpop.eup %805 }
 0xb67   :  { %v434_v39 = vmul.f32 %v806_v38, %v432_v37  ;;  %vm439_vm3 = vweird.f32 %v806_v38 }
 0xb68   :  { %vm440_vm5 = vmor %vm438_vm4, %vm439_vm3 }
 0xb69   :  { %v435_v40 = vsub.f32 1.0, %v434_v39 }
 0xb6b   :  { %v436_v41 = vmul.f32 %v806_v38, %v435_v40 }
 0xb6d   :  { %v437_v42 = vadd.f32 %v806_v38, %v436_v41 }
 0xb6f   :  { %v441_v45 = vsel %vm440_vm5, %v806_v38, %v437_v42 }
 0xb70   :  { %v446_v48 = vsel %vm443_vm6, %v445_v46, %v441_v45  ;;  %vm734_vm6 = vcmask 523264  }
 0xbad   :  { %v450_v47 = vpop.permute.xlu2 %449 }
 0xbae   :  { %v452_v49 = vmul.f32 %v450_v47, %v446_v48 }
 0xbb0   :  { %454 = vrot.lane.b32.xlu0 %v452_v49, %s832_s0 }
 0xc22   :  { %v455_v50 = vpop.permute.xlu0 %454 }
 0xc23   :  { %v457_v51 = vadd.f32 %v455_v50, %v402_v33 }
 0xc25   :  { %807 = vtanh.f32 %v457_v51 }
 0xc2b   :  { %v808_v52 = vpop.eup %807 }
 0xc2c   :  { %v459_v53 = vsub.f32 %v398_v27, %v808_v52 }
 0xc2e   :  { %461 = vrot.lane.b32.xlu1 %v459_v53, %s833_s3 }
 0xca0   :  { %v462_v54 = vpop.permute.xlu1 %461 }
 0xca1   :  { %v464_v55 = vmul.f32 %v462_v54, %v446_v48 }
 0xca3   :  { %466 = vrot.lane.b32.xlu2 %v464_v55, %s834_s7 }
 0xcfd   :  { %v467_v56 = vpop.permute.xlu2 %466 }
 0xcfe   :  { %v469_v57 = vadd.f32 %v808_v52, %v467_v56 }
 0xd00   :  { %475 = vrot.lane.b32.xlu0 %v469_v57, %s832_s0 }
 0xd72   :  { %v476_v58 = vpop.permute.xlu0 %475 }
 0xd73   :  { %757 = vmatmul.msk.f32.vlgmr.msrb.gmra.mxu3 %vm37_vm0, %v476_v58  ;;  %v613_v58 = vld [vmem:[#allocation2 + $0x7] ss:$8 sm:$0xf] }
 0xdf6   :  { %v496_v59 = vpop.f32.mrf.mxu3 }
 0xdf7   :  { %v497_v60 = vadd.f32 %v970_v22, %v496_v59  ;;  %v614_v59 = vld [vmem:[#allocation2 + $0x7] ss:$8 sm:$0xf0] }
 0xdf9   :  { %520 = vrot.lane.b32.xlu1 %v497_v60, %s832_s0  ;;  %v499_v0 = vadd.f32 %v497_v60, %v473_v63  ;;  %v615_v60 = vor.u32 %v614_v59, %v613_v58 }
 0xdfb   :  { %v758_v1 = vmul.f32 -1.442695, %v499_v0 }
 0xdfd   :  { %809 = vpow2.f32 %v758_v1 }
 0xe03   :  { %v810_v2 = vpop.eup %809 }
 0xe04   :  { %v503_v4 = vadd.f32 1.0, %v810_v2 }
 0xe06   :  { %811 = vrcp.f32 %v503_v4  ;;  %v515_v13 = vand.u32 2147483648, %v503_v4  ;;  %vm509_vm8 = vweird.f32 %v503_v4  ;;  %v513_v3 = vand.u32 2147483647, %v503_v4 }
 0xe08   :  { %v516_v14 = vor.u32 1.1754944e-38, %v515_v13  ;;  %vm514_vm10 = vcmp.eq.f32.partialorder %v513_v3, 8.507059e+37 }
 0xe0c   :  { %v812_v5 = vpop.eup %811 }
 0xe0d   :  { %v505_v6 = vmul.f32 %v812_v5, %v503_v4  ;;  %vm510_vm7 = vweird.f32 %v812_v5 }
 0xe0e   :  { %vm511_vm9 = vmor %vm509_vm8, %vm510_vm7 }
 0xe0f   :  { %v506_v8 = vsub.f32 1.0, %v505_v6 }
 0xe11   :  { %v507_v11 = vmul.f32 %v812_v5, %v506_v8 }
 0xe13   :  { %v508_v12 = vadd.f32 %v812_v5, %v507_v11 }
 0xe15   :  { %v512_v7 = vsel %vm511_vm9, %v812_v5, %v508_v12 }
 0xe16   :  { %v517_v15 = vsel %vm514_vm10, %v516_v14, %v512_v7 }
 0xe6b   :  { %v521_v9 = vpop.permute.xlu1 %520 }
 0xe6c   :  { %v523_v10 = vmul.f32 %v521_v9, %v517_v15 }
 0xe6e   :  { %525 = vrot.lane.b32.xlu2 %v523_v10, %s832_s0 }
 0xec8   :  { %v526_v16 = vpop.permute.xlu2 %525 }
 0xec9   :  { %v528_v17 = vadd.f32 %v526_v16, %v473_v63 }
 0xecb   :  { %813 = vtanh.f32 %v528_v17 }
 0xed1   :  { %v814_v18 = vpop.eup %813 }
 0xed2   :  { %v530_v19 = vsub.f32 %v469_v57, %v814_v18 }
 0xed4   :  { %532 = vrot.lane.b32.xlu0 %v530_v19, %s833_s3  ;;  %v685_v19 = vld [vmem:[%s1060_s4 + $0x10] sm:$0xff] }
 0xf46   :  { %v533_v20 = vpop.permute.xlu0 %532 }
 0xf47   :  { %v535_v21 = vmul.f32 %v533_v20, %v517_v15  ;;  %v684_v20 = vld [vmem:[%s1060_s4 + $0x8] sm:$0xff] }
 0xf49   :  { %537 = vrot.lane.b32.xlu1 %v535_v21, %s834_s7  ;;  %v683_v21 = vld [vmem:[%s1060_s4] sm:$0xff] }
 0xfbb   :  { %v538_v23 = vpop.permute.xlu1 %537 }
 0xfbc   :  { %v540_v24 = vadd.f32 %v814_v18, %v538_v23  ;;  %v686_v18 = vld [vmem:[%s1060_s4 + $0x18] sm:$0xff] }
 0xfbd   :  { %708 = vmatpush.msra.mxu3 %v686_v18 }
 0xfbe   :  { %546 = vrot.lane.b32.xlu2 %v540_v24, %s832_s0 }
 0xfbf   :  { %709 = vmatpush.msra.mxu3 %v685_v19 }
 0xfc1   :  { %710 = vmatpush.msra.mxu3 %v684_v20 }
 0xfc3   :  { %711 = vmatpush.msra.mxu3 %v683_v21 }
0x1018   :  { %v547_v25 = vpop.permute.xlu2 %546 }
0x1019   :  { %759 = vmatmul.msk.f32.vlgmr.msrb.gmra.mxu1 %vm37_vm0, %v547_v25 }
0x1096   :  { %v567_v26 = vpop.f32.mrf.mxu1 }
0x1097   :  { %v568_v27 = vadd.f32 %v970_v22, %v567_v26  ;;  %v778_v26 = vld [vmem:[%s1061_s5] ss:$0 sm:$0xff] }
0x1099   :  { %591 = vrot.lane.b32.xlu0 %v568_v27, %s832_s0  ;;  %v570_v31 = vadd.f32 %v568_v27, %v544_v30 }
0x109b   :  { %v760_v32 = vmul.f32 -1.442695, %v570_v31 }
0x109d   :  { %815 = vpow2.f32 %v760_v32 }
0x10a3   :  { %v816_v33 = vpop.eup %815 }
0x10a4   :  { %v574_v34 = vadd.f32 1.0, %v816_v33 }
0x10a6   :  { %817 = vrcp.f32 %v574_v34  ;;  %v586_v40 = vand.u32 2147483648, %v574_v34  ;;  %vm580_vm12 = vweird.f32 %v574_v34  ;;  %v584_v41 = vand.u32 2147483647, %v574_v34 }
0x10a8   :  { %v587_v43 = vor.u32 1.1754944e-38, %v586_v40  ;;  %vm585_vm14 = vcmp.eq.f32.partialorder %v584_v41, 8.507059e+37 }
0x10ac   :  { %v818_v35 = vpop.eup %817 }
0x10ad   :  { %v576_v36 = vmul.f32 %v818_v35, %v574_v34  ;;  %vm581_vm11 = vweird.f32 %v818_v35  ;;  %v716_v34 = vlaneseq }
0x10ae   :  { %vm582_vm13 = vmor %vm580_vm12, %vm581_vm11 }
0x10af   :  { %v577_v37 = vsub.f32 1.0, %v576_v36  ;;  %v717_v36 = vand.u32 127, %v716_v34 }
0x10b1   :  { %v578_v38 = vmul.f32 %v818_v35, %v577_v37 }
0x10b3   :  { %v579_v39 = vadd.f32 %v818_v35, %v578_v38 }
0x10b5   :  { %v583_v42 = vsel %vm582_vm13, %v818_v35, %v579_v39 }
0x10b6   :  { %v588_v45 = vsel %vm585_vm14, %v587_v43, %v583_v42 }
0x110b   :  { %v592_v44 = vpop.permute.xlu0 %591 }
0x110c   :  { %v594_v46 = vmul.f32 %v592_v44, %v588_v45 }
0x110e   :  { %596 = vrot.lane.b32.xlu1 %v594_v46, %s832_s0 }
0x1180   :  { %v597_v47 = vpop.permute.xlu1 %596 }
0x1181   :  { %v599_v48 = vadd.f32 %v597_v47, %v544_v30 }
0x1183   :  { %819 = vtanh.f32 %v599_v48 }
0x1189   :  { %v820_v49 = vpop.eup %819 }
0x118a   :  { %v601_v50 = vsub.f32 %v540_v24, %v820_v49 }
0x118c   :  { %603 = vrot.lane.b32.xlu2 %v601_v50, %s833_s3 }
0x11e6   :  { %v604_v51 = vpop.permute.xlu2 %603 }
0x11e7   :  { %v606_v52 = vmul.f32 %v604_v51, %v588_v45 }
0x11e9   :  { %608 = vrot.lane.b32.xlu0 %v606_v52, %s834_s7 }
0x125b   :  { %v609_v53 = vpop.permute.xlu0 %608 }
0x125c   :  { %v611_v54 = vadd.f32 %v820_v49, %v609_v53 }
0x125e   :  { %617 = vrot.lane.b32.xlu1 %v611_v54, %s832_s0 }
0x12d0   :  { %v618_v55 = vpop.permute.xlu1 %617 }
0x12d1   :  { %761 = vmatmul.msk.f32.vlgmr.msrb.gmra.mxu2 %vm37_vm0, %v618_v55 }
0x1354   :  { %v638_v56 = vpop.f32.mrf.mxu2 }
0x1355   :  { %v639_v57 = vadd.f32 %v970_v22, %v638_v56 }
0x1357   :  { %662 = vrot.lane.b32.xlu2 %v639_v57, %s832_s0  ;;  %v641_v61 = vadd.f32 %v639_v57, %v615_v60 }
0x1359   :  { %v762_v62 = vmul.f32 -1.442695, %v641_v61 }
0x135b   :  { %821 = vpow2.f32 %v762_v62 }
0x1361   :  { %v822_v63 = vpop.eup %821 }
0x1362   :  { %v645_v0 = vadd.f32 1.0, %v822_v63 }
0x1364   :  { %823 = vrcp.f32 %v645_v0  ;;  %v657_v8 = vand.u32 2147483648, %v645_v0  ;;  %vm651_vm1 = vweird.f32 %v645_v0  ;;  %v655_v22 = vand.u32 2147483647, %v645_v0 }
0x1366   :  { %v658_v12 = vor.u32 1.1754944e-38, %v657_v8  ;;  %vm656_vm3 = vcmp.eq.f32.partialorder %v655_v22, 8.507059e+37 }
0x136a   :  { %v824_v1 = vpop.eup %823 }
0x136b   :  { %v647_v2 = vmul.f32 %v824_v1, %v645_v0  ;;  %vm652_vm15 = vweird.f32 %v824_v1 }
0x136c   :  { %vm653_vm2 = vmor %vm651_vm1, %vm652_vm15 }
0x136d   :  { %v648_v4 = vsub.f32 1.0, %v647_v2 }
0x136f   :  { %v649_v5 = vmul.f32 %v824_v1, %v648_v4 }
0x1371   :  { %v650_v6 = vadd.f32 %v824_v1, %v649_v5 }
0x1373   :  { %v654_v11 = vsel %vm653_vm2, %v824_v1, %v650_v6 }
0x1374   :  { %v659_v3 = vsel %vm656_vm3, %v658_v12, %v654_v11 }
0x13b1   :  { %v663_v13 = vpop.permute.xlu2 %662 }
0x13b2   :  { %v665_v7 = vmul.f32 %v663_v13, %v659_v3 }
0x13b4   :  { %667 = vrot.lane.b32.xlu0 %v665_v7, %s832_s0 }
0x1426   :  { %v668_v14 = vpop.permute.xlu0 %667 }
0x1427   :  { %v670_v9 = vadd.f32 %v668_v14, %v615_v60 }
0x1429   :  { %825 = vtanh.f32 %v670_v9 }
0x142f   :  { %v826_v15 = vpop.eup %825 }
0x1430   :  { %v672_v10 = vsub.f32 %v611_v54, %v826_v15 }
0x1432   :  { %674 = vrot.lane.b32.xlu1 %v672_v10, %s833_s3 }
0x14a4   :  { %v675_v16 = vpop.permute.xlu1 %674 }
0x14a5   :  { %v677_v17 = vmul.f32 %v675_v16, %v659_v3 }
0x14a7   :  { %679 = vrot.lane.b32.xlu2 %v677_v17, %s834_s7 }
0x1501   :  { %v680_v23 = vpop.permute.xlu2 %679 }
0x1502   :  { %v682_v24 = vadd.f32 %v826_v15, %v680_v23 }
0x1504   :  { %692 = vrot.lane.b32.xlu0 %v682_v24, %s832_s0 }
0x1576   :  { %v693_v25 = vpop.permute.xlu0 %692 }
0x1577   :  { %763 = vmatmul.msk.f32.vlgmr.msra.gmra.mxu3 %vm37_vm0, %v693_v25  ;;  %vm718_vm0 = vcmp.lt.s32.totalorder %v717_v36, 32 }
0x15fa   :  { %v713_v27 = vpop.f32.mrf.mxu3 }
0x15fb   :  { %v714_v28 = vadd.f32 %v778_v26, %v713_v27 }
0x15fd   :  { %v720_v29 = vmin.f32 %v714_v28, 20.0  ;;  %vm719_vm5 = vcmp.gt.f32.partialorder %v714_v28, 20.0 }
0x15ff   :  { %v721_v30 = vmul.f32 1.442695, %v720_v29 }
0x1601   :  { %827 = vpow2.f32 %v721_v30 }
0x1607   :  { %v828_v31 = vpop.eup %827 }
0x1608   :  { %v723_v32 = vadd.f32 1.0, %v828_v31  ;;  %v726_v33 = vmul.f32 -0.5, %v828_v31  ;;  %v729_v37 = vand.u32 2147483647, %v828_v31 }
0x160a   :  { %829 = vlog2.f32 %v723_v32  ;;  %v727_v35 = vadd.f32 1.0, %v726_v33  ;;  %vm730_vm4 = vcmp.lt.f32.partialorder %v729_v37, 0.0004427343 }
0x160c   :  { %v728_v40 = vmul.f32 %v828_v31, %v727_v35 }
0x1610   :  { %v830_v38 = vpop.eup %829 }
0x1611   :  { %v725_v39 = vmul.f32 0.6931472, %v830_v38 }
0x1613   :  { %v731_v41 = vsel %vm730_vm4, %v728_v40, %v725_v39 }
0x1614   :  { %v732_v42 = vsel %vm719_vm5, %v714_v28, %v731_v41 }
0x1615   :  { %v733_v43 = vsel %vm718_vm0, %v714_v28, %v732_v42 }
0x1616   :  { %735 = vst.msk [vmem:[%s1062_s6] sm:$0xff] %vm734_vm6, %v733_v43 }

</bundles_post_ra>
